<compile_context>
chip_gen: v6e
topology: v6e:2x2x1
jax: 0.10.0
libtpu: 0.0.40
codegen_flags: <defaults>
</compile_context>

<pallas_src>
import jax
import jax.numpy as jnp
from jax.experimental import pallas as pl
from jax.experimental.pallas import tpu as pltpu

_LANE = 128
_MAX_LANE_TILE = 2048            # nominal lane tile when rows are plentiful
_MIN_PALLAS_ELEMS = 1 << 16      # below this, a fused XLA multiply wins
_MAX_TILE_BYTES_HARD = 8 << 20   # never let a single tile exceed this


def _sublane_multiple(dtype) -> int:
    """Native second-minor tiling multiple: f32/i32->8, bf16->16, int8/bool->32."""
    return max(8, 32 // max(jnp.dtype(dtype).itemsize, 1))


def _tpu_generation_params():
    """(tile_target_bytes, min_grid_steps) per TPU generation."""
    try:
        kind = jax.devices()[0].device_kind.lower()
    except Exception:
        kind = ""
    if "v7" in kind:
        # 2 TensorCores/chip: want >= 8 grid steps so "parallel" axes split;
        # HBM ~2.4x v6e, so larger tiles amortize the ~0.35us/step overhead.
        return 4 << 20, 8
    if "v6" in kind:
        return 4 << 20, 1
    # v5e and older / unknown: 16 MiB scoped-VMEM default -> smaller target.
    return 2 << 20, 1


def _mask_mul_kernel(c_ref, m_ref, o_ref):
    # out = condition * mask.  The mask block either matches the condition
    # block or carries singleton axes that broadcast in-register; bool/int8
    # masks are cast here on the VPU (free slot) so only 1 B/elem crosses HBM.
    o_ref[...] = c_ref[...] * m_ref[...].astype(c_ref.dtype)


def _pallas_mul_2d(c2d, m2d, target_bytes, min_steps):
    """Tiled (rows x lanes) gate.  m2d is (rows, 1) (per-row) or c2d.shape.

    Returns None if no VMEM-safe tiling exists (caller falls back to plain XLA,
    which is already at HBM roofline for an isolated elementwise multiply).
    """
    rows, cols = c2d.shape
    mcols = m2d.shape[1]
    ci = jnp.dtype(c2d.dtype).itemsize
    mi = jnp.dtype(m2d.dtype).itemsize
    row_multiple = max(_sublane_multiple(c2d.dtype), _sublane_multiple(m2d.dtype))

    # Lane tile: multiple of 128 when the lane dim is aligned, else the full
    # extent (always a legal block).  Grow past the nominal 2048 when there
    # are few rows so the tile still reaches the byte target.
    if cols % _LANE == 0:
        tl_for_target = (target_bytes // max(rows * ci, 1)) // _LANE * _LANE
        tl = min(cols, max(_MAX_LANE_TILE, tl_for_target))
    else:
        tl = cols

    # Per-row masks occupy a lane-padded (tb, 128) slab in VMEM; full masks a
    # (tb, tl) slab.  Account for both when sizing the row tile.
    mask_row_bytes = (_LANE if mcols == 1 else tl) * mi
    row_bytes = tl * ci + mask_row_bytes
    tb = max(row_multiple,
             (target_bytes // max(row_bytes, 1)) // row_multiple * row_multiple)
    if tb >= rows:
        tb = rows

    # v7x megacore: guarantee enough grid steps for the 2-TensorCore split.
    while pl.cdiv(rows, tb) * pl.cdiv(cols, tl) < min_steps:
        if tb > row_multiple:
            tb = max(row_multiple, (tb // 2) // row_multiple * row_multiple)
        elif cols % _LANE == 0 and tl > _LANE:
            tl = max(_LANE, (tl // 2) // _LANE * _LANE)
        else:
            break

    mask_row_bytes = (_LANE if mcols == 1 else tl) * mi
    if tb * (tl * ci + mask_row_bytes) > _MAX_TILE_BYTES_HARD:
        return None  # pathological: huge non-lane-aligned feature dim

    grid = (pl.cdiv(rows, tb), pl.cdiv(cols, tl))
    if mcols == 1:
        m_spec = pl.BlockSpec((tb, 1), lambda i, j: (i, 0))
    else:
        m_spec = pl.BlockSpec((tb, tl), lambda i, j: (i, j))

    return pl.pallas_call(
        _mask_mul_kernel,
        out_shape=jax.ShapeDtypeStruct((rows, cols), c2d.dtype),
        grid=grid,
        in_specs=[pl.BlockSpec((tb, tl), lambda i, j: (i, j)), m_spec],
        out_specs=pl.BlockSpec((tb, tl), lambda i, j: (i, j)),
        compiler_params=pltpu.CompilerParams(
            dimension_semantics=("parallel", "parallel")),
    )(c2d, m2d)


def _pallas_mul_bcast3d(c3d, m3d, target_bytes):
    """Gate with a mask broadcast along the middle axis, never materialized in
    HBM: the mask BlockSpec's index_map ignores that grid axis.
    c3d: (P, T, S);  m3d: (P, 1, S)."""
    P, T, S = c3d.shape
    ci = jnp.dtype(c3d.dtype).itemsize
    mi = jnp.dtype(m3d.dtype).itemsize
    row_multiple = _sublane_multiple(c3d.dtype)

    ts = min(S, _MAX_LANE_TILE) if S % _LANE == 0 else S
    budget = max(target_bytes - ts * mi, row_multiple * ts * ci)
    tt = max(row_multiple,
             (budget // max(ts * ci, 1)) // row_multiple * row_multiple)
    if tt >= T:
        tt = T
    if tt * ts * ci + ts * mi > _MAX_TILE_BYTES_HARD:
        return None

    grid = (P, pl.cdiv(T, tt), pl.cdiv(S, ts))
    return pl.pallas_call(
        _mask_mul_kernel,
        out_shape=jax.ShapeDtypeStruct((P, T, S), c3d.dtype),
        grid=grid,
        in_specs=[
            pl.BlockSpec((1, tt, ts), lambda p, t, s: (p, t, s)),
            pl.BlockSpec((1, 1, ts), lambda p, t, s: (p, 0, s)),  # ignores t
        ],
        out_specs=pl.BlockSpec((1, tt, ts), lambda p, t, s: (p, t, s)),
        compiler_params=pltpu.CompilerParams(
            dimension_semantics=("parallel", "parallel", "parallel")),
    )(c3d, m3d)


def base_nn_condition_forward(condition, mask=None, *,
                              min_pallas_elems=_MIN_PALLAS_ELEMS):
    """Identity(+mask) condition forward: out = condition * mask (or identity).

    condition: (..., D) array.
    mask:      None, or an array broadcastable to the condition after
               *trailing* singleton expansion (CleanDiffuser `at_least_ndim`
               convention: (B,), (B, 1), (B, 1, D), or the full shape).
    Returns an array with the same shape/dtype as `condition`.
    """
    if mask is None:
        return condition                       # pure identity: no kernel, no copy

    cond = jnp.asarray(condition)
    m = jnp.asarray(mask)
    mask_shape = m.shape
    if m.dtype == jnp.bool_:
        # bool -> int8 is a 1-byte relabel; keeps mask HBM traffic at 1 B/elem
        # and defers the float cast to the VPU inside the kernel.
        m = m.astype(jnp.int8)

    if m.ndim > cond.ndim:
        raise ValueError(f"mask rank {m.ndim} exceeds condition rank {cond.ndim}")
    if m.ndim < cond.ndim:
        # CleanDiffuser `at_least_ndim`: pad with *trailing* singleton axes.
        m = m.reshape(m.shape + (1,) * (cond.ndim - m.ndim))
    for md, cd in zip(m.shape, cond.shape):
        if md != cd and md != 1:
            # e.g. (B, D) mask on a (B, T, D) condition: trailing expansion is
            # not broadcastable -> reject instead of gating the wrong axis.
            raise ValueError(
                f"mask shape {mask_shape} is not (trailing-)broadcastable to "
                f"condition shape {cond.shape}")

    # Tiny / degenerate inputs: a single fused XLA multiply is already at HBM
    # roofline and fuses with producers/consumers.
    if cond.size == 0 or m.size == 1 or cond.size < min_pallas_elems:
        return cond * m.astype(cond.dtype)

    target_bytes, min_steps = _tpu_generation_params()
    shape, ndim = cond.shape, cond.ndim
    bcast = [i for i in range(ndim) if m.shape[i] == 1 and shape[i] != 1]

    def _lane_dense_repack(total, last_dim):
        lanes = last_dim
        if lanes % _LANE != 0:
            for cand in (2048, 1024, 512, 256, _LANE):
                if total % cand == 0:
                    lanes = cand
                    break
        return lanes

    if not bcast:
        # Full mask (same element count): flatten both into one lane-dense slab
        # (last dim a multiple of 128 whenever possible -> unmasked vst).
        lanes = _lane_dense_repack(cond.size, shape[-1])
        rows = cond.size // lanes
        out = _pallas_mul_2d(cond.reshape(rows, lanes), m.reshape(rows, lanes),
                             target_bytes, min_steps)
    else:
        lo, hi = min(bcast), max(bcast)
        contiguous = all(m.shape[i] == 1 for i in range(lo, hi + 1))
        if contiguous and hi == ndim - 1:
            # Per-sample / per-prefix mask: condition -> (rows, prod(trailing)),
            # mask stays exactly (rows, 1) and is broadcast over the lane axis
            # in-register; prod(trailing) is wide and usually 128-aligned even
            # when D alone (64/96/...) is not.
            rows = 1
            for d_ in shape[:lo]:
                rows *= d_
            cols = cond.size // rows
            out = _pallas_mul_2d(cond.reshape(rows, cols), m.reshape(rows, 1),
                                 target_bytes, min_steps)
        elif contiguous:
            # Mask broadcast along a contiguous block of middle/leading axes,
            # e.g. (B, 1, D) gating (B, T, D): keep the mask un-broadcast.
            p = 1
            for d_ in shape[:lo]:
                p *= d_
            t = 1
            for d_ in shape[lo:hi + 1]:
                t *= d_
            s = cond.size // (p * t)
            out = _pallas_mul_bcast3d(cond.reshape(p, t, s), m.reshape(p, 1, s),
                                      target_bytes)
        else:
            # TODO(synk): non-contiguous broadcast axes (rare, e.g. (1, T, 1))
            # fall back to materializing the broadcast mask once.
            m_full = jnp.broadcast_to(m, shape)
            lanes = _lane_dense_repack(cond.size, shape[-1])
            rows = cond.size // lanes
            out = _pallas_mul_2d(cond.reshape(rows, lanes),
                                 m_full.reshape(rows, lanes),
                                 target_bytes, min_steps)

    if out is None:
        # No VMEM-safe tiling (pathological lane dim): plain XLA multiply.
        return cond * m.astype(cond.dtype)
    return out.reshape(shape)


if __name__ == "__main__":
    key = jax.random.PRNGKey(0)
    k1, k2, k3, k4, k5 = jax.random.split(key, 5)

    B, T, D = 2, 8, 32

    # 1) Per-sample (CFG-style) mask: (B, 1) gating a (B, T, D) condition.
    cond3 = jax.random.normal(k1, (B, T, D), dtype=jnp.float32)
    mask_b1 = (jax.random.uniform(k2, (B, 1)) > 0.5).astype(jnp.float32)
    out3 = base_nn_condition_forward(cond3, mask_b1, min_pallas_elems=0)
    ref3 = cond3 * mask_b1.reshape(B, 1, 1)
    assert out3.shape == cond3.shape and jnp.allclose(out3, ref3)

    # 2) Identity (mask=None): pure pass-through.
    out_id = base_nn_condition_forward(cond3, None)
    assert jnp.allclose(out_id, cond3)

    # 3) Full-shape *bool* mask with a non-lane-aligned feature dim (D=96):
    #    exercises lane-dense repack + in-kernel int8->f32 cast.
    cond_f = jax.random.normal(k3, (B, T, 96), dtype=jnp.float32)
    mask_f = jax.random.uniform(k4, (B, T, 96)) > 0.5
    out_f = base_nn_condition_forward(cond_f, mask_f, min_pallas_elems=0)
    assert jnp.allclose(out_f, cond_f * mask_f.astype(jnp.float32))

    # 4) Partially-broadcast feature mask (B, 1, D') on (B, T, D'): the mask is
    #    never materialized at full size in HBM (index_map ignores the T axis).
    cond_m = jax.random.normal(k5, (B, T, 128), dtype=jnp.float32)
    mask_m = (jax.random.uniform(k2, (B, 1, 128)) > 0.5).astype(jnp.float32)
    out_m = base_nn_condition_forward(cond_m, mask_m, min_pallas_elems=0)
    assert jnp.allclose(out_m, cond_m * mask_m)

    # 5) Small 2-D case through the fused-XLA fast path (default threshold).
    cond2 = jax.random.normal(k1, (B, D), dtype=jnp.float32)
    mask2 = (jax.random.uniform(k2, (B, 1)) > 0.5).astype(jnp.float32)
    out2 = base_nn_condition_forward(cond2, mask2)
    assert jnp.allclose(out2, cond2 * mask2)

    jax.block_until_ready((out3, out_id, out_f, out_m, out2))
    print("KERNEL_OK")
</pallas_src>

<mosaic_0001>
module attributes {stable_mosaic.version = 11 : i64} {
  func.func @_mask_mul_kernel(%arg0: i32, %arg1: i32, %arg2: memref<2x256xf32, #tpu.memory_space<vmem>>, %arg3: memref<2x1xf32, #tpu.memory_space<vmem>>, %arg4: memref<2x256xf32, #tpu.memory_space<vmem>>) attributes {dimension_semantics = [#tpu.dimension_semantics<parallel>, #tpu.dimension_semantics<parallel>], iteration_bounds = array<i64: 1, 1>, scalar_prefetch = 0 : i64, scratch_operands = 0 : i64, tpu.core_type = #tpu.core_type<tc>, window_params = [{transform_indices = @transform_0, window_bounds = array<i64: 2, 256>}, {transform_indices = @transform_1, window_bounds = array<i64: 2, 1>}, {transform_indices = @transform_2, window_bounds = array<i64: 2, 256>}]} {
    %c0 = arith.constant 0 : index
    %c0_0 = arith.constant 0 : index
    %0 = vector.load %arg2[%c0, %c0_0] : memref<2x256xf32, #tpu.memory_space<vmem>>, vector<2x256xf32>
    %c0_1 = arith.constant 0 : index
    %c0_2 = arith.constant 0 : index
    %1 = vector.load %arg3[%c0_1, %c0_2] : memref<2x1xf32, #tpu.memory_space<vmem>>, vector<2x1xf32>
    %2 = vector.broadcast %1 : vector<2x1xf32> to vector<2x256xf32>
    %3 = arith.mulf %0, %2 : vector<2x256xf32>
    %c0_3 = arith.constant 0 : index
    %c0_4 = arith.constant 0 : index
    %4 = vector.load %arg4[%c0_3, %c0_4] : memref<2x256xf32, #tpu.memory_space<vmem>>, vector<2x256xf32>
    tpu.vector_store %arg4[%c0_3, %c0_4], %3 {strides = array<i32>} : memref<2x256xf32, #tpu.memory_space<vmem>>, vector<2x256xf32>,
    return
  }
  func.func @transform_0(%arg0: i32, %arg1: i32) -> (i32, i32) {
    %c0_i32 = arith.constant 0 : i32
    return %arg0, %arg1 : i32, i32
  }
  func.func @transform_1(%arg0: i32, %arg1: i32) -> (i32, i32) {
    %c0_i32 = arith.constant 0 : i32
    %c0_i32_0 = arith.constant 0 : i32
    return %arg0, %c0_i32 : i32, i32
  }
  func.func @transform_2(%arg0: i32, %arg1: i32) -> (i32, i32) {
    %c0_i32 = arith.constant 0 : i32
    return %arg0, %arg1 : i32, i32
  }
}

</mosaic_0001>

<bundles_post_ra>
// kernel: tpu_custom_call.1
= control target key start
LH: loop header
LB: loop body
LE: loop exit
PB: predicated region body
PF: predicated region fallthrough
CT: control target
= control target key end

     0   :  { %7 = vsyncpa [#allocation3], 0  ;;  %s132_s0 = inlined_call_operand.hbm [shape: f32[2,256], index: 0, kind: input, shape index: {}]   ;;  %s133_s1 = inlined_call_operand.vmem [shape: f32[2,1], index: 1, kind: input, shape index: {}]   ;;  %s134_s2 = inlined_call_operand.hbm [shape: f32[2,256], index: 2, kind: output, shape index: {}]  }
   0x1   :  { %8 = vsyncpa [#allocation4], 0  ;;  %s104_s9 = smov [#allocation2]  }
   0x2   :  { %s15_s10 = sshll.u32 %s104_s9, 4  ;;  %s16_s10 = int_to_ptr.vmem [resolvable:$true] %s15_s10 }
   0x3   :  { %s68_s11 = scalar_lea.vmem %s16_s10, 64  ;;  %p73_p1 = scmp.lt.s32.totalorder %s16_s10, %s16_s10 }
   0x4   :  { %p69_p0 = scmp.ne.s32.totalorder %s16_s10, %s68_s11  ;;  %p74_p2 = scmp.lt.s32.totalorder %s68_s11, %s68_s11 }
   0x6   :  { %p75_p3 = por %p74_p2, %p73_p1 }
   0x8   :  { %p76_p4 = pnand %p75_p3, %p69_p0 }
   0xa   :  { %79 = shalt.err (!%p76_p4)
}
   0xb   :  { %18 = dma.hbm_to_vmem [thread:$0]  %s132_s0, 64, %s16_s10, [#allocation3]  }
   0xc   :  { %100 = dma.done.wait [#allocation3], 64  }
   0xd   :  { %101 = vsyncadd [#allocation3], 4294967232  ;;  %v105_v0 = vmov 0   ;;  %v25_v1 = vld [vmem:[%s133_s1] sm:$0x3]  ;;  %v33_v4 = vlaneseq  ;;  %s107_s16 = smov [#allocation5]  }
   0xe   :  { %59 = vset.pattern.permute.xlu0 %v105_v0  ;;  %v106_v2 = vmov 269488144   ;;  %v24_v9 = vld [vmem:[#allocation2] sm:$0xf]  ;;  %s46_s17 = sshll.u32 %s107_s16, 4  ;;  %s47_s17 = int_to_ptr.vmem [resolvable:$true] %s46_s17 }
   0xf   :  { %28 = vperm.xlu0 %59, %v25_v1   ;;  %v31_v3 = vunpack.c.l.s4 %v106_v2  ;;  %v34_v6 = vshrl.u32 %v33_v4, 7  ;;  %s80_s0 = scalar_lea.vmem %s47_s17, 64  ;;  %p85_p6 = scmp.lt.s32.totalorder %s47_s17, %s47_s17 }
  0x10   :  { %p81_p5 = scmp.ne.s32.totalorder %s47_s17, %s80_s0  ;;  %p86_p7 = scmp.lt.s32.totalorder %s80_s0, %s80_s0 }
  0x11   :  { %v32_v5 = vunpack.c.0.s8 %v31_v3 }
  0x12   :  { %p87_p8 = por %p86_p7, %p85_p6 }
  0x13   :  { %v35_v7 = vsub.s32 %v32_v5, %v34_v6 }
  0x14   :  { %p88_p9 = pnand %p87_p8, %p81_p5 }
  0x8a   :  { %v29_v8 = vpop.permute.xlu0 %28 }
  0x8b   :  { %v36_v10 = vrot.slane %v29_v8, %v35_v7 }
  0x8d   :  { %v38_v11 = vmul.f32 %v36_v10, %v24_v9 }
  0x8f   :  { %39 = vst [vmem:[#allocation5] sm:$0xf] %v38_v11 }
  0x90   :  { %91 = shalt.err (!%p88_p9)
}
  0x91   :  { %49 = dma.vmem_to_hbm [thread:$0]  %s47_s17, 64, %s134_s2, [#allocation4]  }
  0x92   :  { %102 = dma.done.wait [#allocation4], 64  }
  0x93   :  { %103 = vsyncadd [#allocation4], 4294967232 }
  0x94   :  { %53 = vsyncpa [#allocation3], 1 }
  0x95   :  { %54 = vsyncpa [#allocation4], 1 }

</bundles_post_ra>
